<compile_context>
chip_gen: v7x
topology: tpu7x:2x2x1
jax: 0.10.0
libtpu: 0.0.40
codegen_flags: <defaults>
</compile_context>

<pallas_src>
import jax
import jax.numpy as jnp
from jax.experimental import pallas as pl
from jax.experimental.pallas import tpu as pltpu


def _lecun_tanh_kernel(x_ref, o_ref):
    # Elementwise on the VPU; tanh goes to the EUP slot. Compute in f32 so the
    # same kernel is correct on v5e (no bf16 VPU/EUP) and precise everywhere.
    x = x_ref[...].astype(jnp.float32)
    o_ref[...] = (1.7159 * jnp.tanh(0.666 * x)).astype(o_ref.dtype)


def _round_up(v: int, m: int) -> int:
    return ((v + m - 1) // m) * m


def lecun_tanh(x: jnp.ndarray, *, target_block_bytes: int = 2 * 1024 * 1024) -> jnp.ndarray:
    """Apply LeCun tanh elementwise to an arbitrarily-shaped array."""
    orig_shape = x.shape
    dtype = x.dtype
    n = x.size
    if n == 0:
        return x

    itemsize = jnp.dtype(dtype).itemsize
    # Sublane packing: 8 rows/tile for 32-bit, 16 for bf16, 32 for 8-bit.
    sub = max(8, 32 // itemsize)

    # --- Choose a lane-dense slab layout --------------------------------
    # Prefer a wide lane dimension (longer unit-stride vst bursts) when the
    # element count divides cleanly; otherwise fall back to 128 lanes.
    lanes = 128
    for cand in (4096, 2048, 1024, 512, 256):
        if n % cand == 0 and (n // cand) >= sub:
            lanes = cand
            break

    ragged = (n % lanes) != 0
    if not ragged:
        # Fast path: pure reshape, no extra HBM traffic.
        rows = n // lanes
        x2d = x.reshape(rows, lanes)
    else:
        # Ragged path: pad up to a whole number of 128-lane rows.
        lanes = 128
        rows = pl.cdiv(n, lanes)
        flat = jnp.pad(jnp.ravel(x), (0, rows * lanes - n))
        x2d = flat.reshape(rows, lanes)

    # --- Pick the row tile ----------------------------------------------
    # ~target_block_bytes per block, sublane-aligned; cdiv grid handles a
    # non-dividing final block (no divisor search, no degenerate tiny tiles).
    tr_cap = max(sub, (target_block_bytes // (lanes * itemsize)) // sub * sub)
    # Aim for a handful of grid steps so v7x's 2 TensorCores both get work.
    min_steps = 4
    tr = min(tr_cap, _round_up(max(1, -(-rows // min_steps)), sub))
    tr = max(tr, sub)
    if tr >= rows:
        tr = rows  # full first dim is always a legal block shape
    grid = (pl.cdiv(rows, tr),)

    out2d = pl.pallas_call(
        _lecun_tanh_kernel,
        out_shape=jax.ShapeDtypeStruct((rows, lanes), dtype),
        grid_spec=pltpu.PrefetchScalarGridSpec(
            num_scalar_prefetch=0,
            grid=grid,
            in_specs=[pl.BlockSpec((tr, lanes), lambda i: (i, 0))],
            out_specs=pl.BlockSpec((tr, lanes), lambda i: (i, 0)),
        ),
        compiler_params=pltpu.CompilerParams(
            dimension_semantics=("parallel",),
        ),
        cost_estimate=pl.CostEstimate(
            flops=2 * n,
            transcendentals=n,
            bytes_accessed=2 * n * itemsize,
        ),
    )(x2d)

    if not ragged:
        return out2d.reshape(orig_shape)
    return out2d.reshape(-1)[:n].reshape(orig_shape)


if __name__ == "__main__":
    key = jax.random.PRNGKey(0)
    # Shape consistent with a conv-style NCHW activation input.
    x = jax.random.normal(key, (2, 4, 16, 16), dtype=jnp.float32)

    y = lecun_tanh(x)
    y = jax.block_until_ready(y)

    # Reference check in plain JAX (same 0.666 constant as the PyTorch module).
    ref = 1.7159 * jnp.tanh(0.666 * x)
    assert y.shape == x.shape and y.dtype == x.dtype
    assert jnp.allclose(y, ref, atol=1e-6, rtol=1e-6)

    # Also exercise a ragged size (hits the pad/slice fallback path).
    x2 = jax.random.normal(jax.random.PRNGKey(1), (3, 5, 7), dtype=jnp.float32)
    y2 = jax.block_until_ready(lecun_tanh(x2))
    ref2 = 1.7159 * jnp.tanh(0.666 * x2)
    assert jnp.allclose(y2, ref2, atol=1e-6, rtol=1e-6)

    print("KERNEL_OK")
</pallas_src>

<mosaic_0001>
module attributes {stable_mosaic.version = 11 : i64} {
  func.func @_lecun_tanh_kernel(%arg0: i32, %arg1: memref<8x256xf32, #tpu.memory_space<vmem>>, %arg2: memref<8x256xf32, #tpu.memory_space<vmem>>) attributes {dimension_semantics = [#tpu.dimension_semantics<parallel>], iteration_bounds = array<i64: 1>, scalar_prefetch = 0 : i64, scratch_operands = 0 : i64, tpu.core_type = #tpu.core_type<tc>, window_params = [{transform_indices = @transform_0, window_bounds = array<i64: 8, 256>}, {transform_indices = @transform_1, window_bounds = array<i64: 8, 256>}]} {
    %c0 = arith.constant 0 : index
    %c0_0 = arith.constant 0 : index
    %0 = vector.load %arg1[%c0, %c0_0] : memref<8x256xf32, #tpu.memory_space<vmem>>, vector<8x256xf32>
    %cst = arith.constant 6.660000e-01 : f32
    %1 = vector.broadcast %cst : f32 to vector<8x256xf32>
    %2 = arith.mulf %1, %0 : vector<8x256xf32>
    %3 = math.tanh %2 : vector<8x256xf32>
    %cst_1 = arith.constant 1.715900e+00 : f32
    %4 = vector.broadcast %cst_1 : f32 to vector<8x256xf32>
    %5 = arith.mulf %4, %3 : vector<8x256xf32>
    %c0_2 = arith.constant 0 : index
    %c0_3 = arith.constant 0 : index
    %6 = vector.load %arg2[%c0_2, %c0_3] : memref<8x256xf32, #tpu.memory_space<vmem>>, vector<8x256xf32>
    tpu.vector_store %arg2[%c0_2, %c0_3], %5 {strides = array<i32>} : memref<8x256xf32, #tpu.memory_space<vmem>>, vector<8x256xf32>,
    return
  }
  func.func @transform_0(%arg0: i32) -> (i32, i32) {
    %c0_i32 = arith.constant 0 : i32
    %c0_i32_0 = arith.constant 0 : i32
    return %arg0, %c0_i32 : i32, i32
  }
  func.func @transform_1(%arg0: i32) -> (i32, i32) {
    %c0_i32 = arith.constant 0 : i32
    %c0_i32_0 = arith.constant 0 : i32
    return %arg0, %c0_i32 : i32, i32
  }
}

</mosaic_0001>

<bundles_post_ra>
// kernel: tpu_custom_call.1
= control target key start
LH: loop header
LB: loop body
LE: loop exit
PB: predicated region body
PF: predicated region fallthrough
CT: control target
= control target key end

     0   :  { %6 = vsyncpa [#allocation3], 0  ;;  %s136_s0 = inlined_call_operand.hbm [shape: f32[8,256], index: 0, kind: input, shape index: {}]   ;;  %s137_s1 = inlined_call_operand.hbm [shape: f32[8,256], index: 1, kind: output, shape index: {}]  }
   0x1   :  { %7 = vsyncpa [#allocation4], 0  ;;  %s100_s6 = smov [#allocation2]   ;;  %s52_s10 = scalar_lea.hbm %s136_s0, 256 }
   0x2   :  { %s14_s7 = sshll.u32 %s100_s6, 4  ;;  %p53_p0 = scmp.ne.s32.totalorder %s136_s0, %s52_s10  ;;  %s15_s7 = int_to_ptr.vmem [resolvable:$true] %s14_s7 }
   0x3   :  { %p56_p1 = scmp.lt.u32.totalorder %s52_s10, %s136_s0 }
   0x5   :  { %p58_p2 = pnand %p56_p1, %p53_p0 }
   0x7   :  { %61 = shalt.err (!%p58_p2)
}
   0x8   :  { %s62_s15 = scalar_lea.vmem %s15_s7, 256  ;;  %p67_p4 = scmp.lt.s32.totalorder %s15_s7, %s15_s7 }
   0x9   :  { %p63_p3 = scmp.ne.s32.totalorder %s15_s7, %s62_s15  ;;  %p68_p5 = scmp.lt.s32.totalorder %s62_s15, %s62_s15 }
   0xb   :  { %p69_p6 = por %p68_p5, %p67_p4 }
   0xd   :  { %p70_p7 = pnand %p69_p6, %p63_p3 }
   0xf   :  { %73 = shalt.err (!%p70_p7)
}
  0x10   :  { %17 = dma.hbm_to_vmem [thread:$0]  %s136_s0, 256, %s15_s7, [#allocation3]  }
  0x11   :  { %96 = dma.done.wait [#allocation3], 256  }
  0x12   :  { %97 = vsyncadd [#allocation3], 4294967040  ;;  %v21_v0 = vld [vmem:[#allocation2] sm:$0xff]  ;;  %v22_v1 = vld [vmem:[#allocation2 + $0x8] sm:$0xff]  ;;  %s101_s18 = smov [#allocation5]  }
  0x13   :  { %v23_v2 = vmul.f32 0.666, %v21_v0  ;;  %v24_v3 = vmul.f32 0.666, %v22_v1  ;;  %s37_s19 = sshll.u32 %s101_s18, 4  ;;  %s38_s19 = int_to_ptr.vmem [resolvable:$true] %s37_s19 }
  0x14   :  { %s74_s20 = scalar_lea.vmem %s38_s19, 256  ;;  %p79_p9 = scmp.lt.s32.totalorder %s38_s19, %s38_s19 }
  0x15   :  { %48 = vtanh.f32 %v23_v2  ;;  %p75_p8 = scmp.ne.s32.totalorder %s38_s19, %s74_s20  ;;  %p80_p10 = scmp.lt.s32.totalorder %s74_s20, %s74_s20 }
  0x16   :  { %50 = vtanh.f32 %v24_v3 }
  0x17   :  { %p81_p11 = por %p80_p10, %p79_p9 }
  0x19   :  { %p82_p12 = pnand %p81_p11, %p75_p8 }
  0x1f   :  { %v49_v4 = vpop.eup %48 }
  0x20   :  { %v51_v5 = vpop.eup %50  ;;  %v27_v6 = vmul.f32 1.7159, %v49_v4 }
  0x21   :  { %v28_v7 = vmul.f32 1.7159, %v51_v5 }
  0x22   :  { %29 = vst [vmem:[#allocation5] sm:$0xff] %v27_v6 }
  0x23   :  { %30 = vst [vmem:[#allocation5 + $0x8] sm:$0xff] %v28_v7 }
  0x24   :  { %85 = shalt.err (!%p82_p12)
}
  0x25   :  { %s86_s22 = scalar_lea.hbm %s137_s1, 256 }
  0x26   :  { %p87_p13 = scmp.ne.s32.totalorder %s137_s1, %s86_s22  ;;  %p90_p0 = scmp.lt.u32.totalorder %s86_s22, %s137_s1 }
  0x28   :  { %p92_p1 = pnand %p90_p0, %p87_p13 }
  0x2a   :  { %95 = shalt.err (!%p92_p1)
}
  0x2b   :  { %40 = dma.vmem_to_hbm [thread:$0]  %s38_s19, 256, %s137_s1, [#allocation4]  }
  0x2c   :  { %98 = dma.done.wait [#allocation4], 256  }
  0x2d   :  { %99 = vsyncadd [#allocation4], 4294967040 }
  0x2e   :  { %44 = vsyncpa [#allocation3], 1 }
  0x2f   :  { %45 = vsyncpa [#allocation4], 1 }

</bundles_post_ra>
